<compile_context>
chip_gen: v6e
topology: v6e:2x2x1
jax: 0.10.0
libtpu: 0.0.40
codegen_flags: <defaults>
</compile_context>

<pallas_src>
import math

import jax
import jax.numpy as jnp
from jax.experimental import pallas as pl
from jax.experimental.pallas import tpu as pltpu


def _pos_map_fusion_kernel(xy_ref, w1t_ref, b1t_ref, w2t_ref, b2t_ref,
                           x_ref, o_ref):
    """One grid step (hw tile s, row tile r): out = x + pos(xy).

    xy_ref : [2, T]          row 0 = x coords, row 1 = y coords of this HW tile
    w1t_ref: [H, 2]          b1t_ref: [H, 1]
    w2t_ref: [ROW_TILE, H]   w2.T tiled across the row block (ROW_TILE//C copies)
    b2t_ref: [ROW_TILE, 1]
    x_ref  : [ROW_TILE, T]   feature rows (row = n*C + c)
    o_ref  : [ROW_TILE, T]
    """
    xr = xy_ref[0:1, :]                                   # [1, T]
    yr = xy_ref[1:2, :]                                   # [1, T]
    # Linear(2, hidden): contraction dim of 2 would waste the MXU -> two VPU
    # broadcast FMAs instead.
    h = jnp.maximum(
        w1t_ref[:, 0:1] * xr + w1t_ref[:, 1:2] * yr + b1t_ref[...], 0.0)  # [H, T]
    # Linear(hidden, C) on the MXU, produced directly in row-tiled [ROW_TILE, T]
    # layout (lane dense, no in-kernel transpose or tile).
    pos = jnp.dot(w2t_ref[...], h,
                  preferred_element_type=jnp.float32,
                  precision=jax.lax.Precision.HIGHEST) + b2t_ref[...]
    # Hot path: lane-dense load + VPU add + lane-dense store.
    o_ref[...] = x_ref[...] + pos


def _pick_tiles(nc, c, hw, *, max_rows=256, max_lanes=4096,
                block_budget_bytes=32 * 1024 * 1024):
    """Pick (ROW_TILE, HW_TILE).

    ROW_TILE is a multiple of C (so the host-tiled w2 lines up with channels)
    and, when possible, a multiple of 8 that divides N*C.  HW_TILE is a
    multiple of 128 dividing HW (or full HW when HW % 128 != 0).  The pair
    maximizes block volume under a VMEM budget covering ~5 live block-sized
    buffers (2x double-buffered input, 2x output, 1x pos temp).
    """
    # Lane-tile candidates.
    if hw % 128 == 0:
        hw_cands = [t for t in range(128, min(hw, max_lanes) + 1, 128)
                    if hw % t == 0] or [hw]
    else:
        # TODO(synk): HW not a multiple of 128 keeps the full last dim (masked
        # partial stores); only matters for odd feature-map sizes.
        hw_cands = [hw]

    # Row-tile candidates: multiples of lcm(C, 8) that divide N*C.
    base = (c * 8) // math.gcd(c, 8)
    if nc % base == 0:
        row_cands = [t for t in range(base, min(nc, max_rows) + 1, base)
                     if nc % t == 0]
        if not row_cands:
            row_cands = [base]          # lcm(C, 8) > max_rows: one channel period
    else:
        row_cands = [nc]                # e.g. N*C < 8: full first dim (allowed)

    best = None
    for r in row_cands:
        for t in hw_cands:
            if 5 * r * t * 4 > block_budget_bytes:
                continue
            if best is None or r * t > best[0] * best[1]:
                best = (r, t)
    if best is None:                    # nothing fits the budget: take smallest
        best = (min(row_cands), min(hw_cands))
    return best


def pos_map_fusion(in_feat_map, w1, b1, w2, b2):
    """PosMapFusion.forward on the {in_key} feature map.

    in_feat_map: [N, C, fH, fW] float32 (NCHW).  Returns [N, C, fH, fW] float32.
    """
    N, C, fH, fW = in_feat_map.shape
    hidden = w1.shape[1]
    HW = fH * fW
    NC = N * C

    # Normalized meshgrid, identical to torch.linspace/meshgrid('xy'):
    # row k = i*fW + j holds (pts_x[j], pts_y[i]).  Built transposed: [2, HW].
    pts_x = jnp.linspace(0.5 / fW, 1.0 - 0.5 / fW, fW, dtype=jnp.float32)
    pts_y = jnp.linspace(0.5 / fH, 1.0 - 0.5 / fH, fH, dtype=jnp.float32)
    gx, gy = jnp.meshgrid(pts_x, pts_y, indexing="xy")        # each [fH, fW]
    xy_t = jnp.stack([gx.reshape(-1), gy.reshape(-1)], axis=0)  # [2, HW]

    ROW_TILE, HW_TILE = _pick_tiles(NC, C, HW)
    reps = ROW_TILE // C

    # Pre-transposed / row-tiled MLP parameters so the kernel works directly in
    # the row-tiled [ROW_TILE, HW] layout.
    w1t = w1.T                                       # [hidden, 2]
    b1t = b1.reshape(-1, 1)                          # [hidden, 1]
    w2t = jnp.tile(w2.T, (reps, 1))                  # [ROW_TILE, hidden]
    b2t = jnp.tile(b2.reshape(-1, 1), (reps, 1))     # [ROW_TILE, 1]

    x_flat = in_feat_map.reshape(NC, HW)
    grid = (HW // HW_TILE, NC // ROW_TILE)

    grid_spec = pltpu.PrefetchScalarGridSpec(
        num_scalar_prefetch=0,
        grid=grid,
        in_specs=[
            pl.BlockSpec((2, HW_TILE), lambda s, r: (0, s)),          # xy_t
            pl.BlockSpec((hidden, 2), lambda s, r: (0, 0)),           # w1t
            pl.BlockSpec((hidden, 1), lambda s, r: (0, 0)),           # b1t
            pl.BlockSpec((ROW_TILE, hidden), lambda s, r: (0, 0)),    # w2t (tiled)
            pl.BlockSpec((ROW_TILE, 1), lambda s, r: (0, 0)),         # b2t (tiled)
            pl.BlockSpec((ROW_TILE, HW_TILE), lambda s, r: (r, s)),   # x
        ],
        out_specs=pl.BlockSpec((ROW_TILE, HW_TILE), lambda s, r: (r, s)),
    )

    out_flat = pl.pallas_call(
        _pos_map_fusion_kernel,
        out_shape=jax.ShapeDtypeStruct((NC, HW), jnp.float32),
        grid_spec=grid_spec,
        input_output_aliases={5: 0},     # out = in + pos -> donate x buffer
        compiler_params=pltpu.CompilerParams(
            # Stateless kernel -> both axes can shard across v7x's 2 TCs.
            dimension_semantics=("parallel", "parallel"),
            vmem_limit_bytes=48 * 1024 * 1024,
        ),
    )(xy_t, w1t, b1t, w2t, b2t, x_flat)

    return out_flat.reshape(N, C, fH, fW)


def _reference(in_feat_map, w1, b1, w2, b2):
    """Pure-JAX reference mirroring the PyTorch forward."""
    N, C, fH, fW = in_feat_map.shape
    pts_x = jnp.linspace(0.5 / fW, 1.0 - 0.5 / fW, fW, dtype=jnp.float32)
    pts_y = jnp.linspace(0.5 / fH, 1.0 - 0.5 / fH, fH, dtype=jnp.float32)
    gx, gy = jnp.meshgrid(pts_x, pts_y, indexing="xy")
    norm_xy = jnp.stack([gx, gy], axis=2).reshape(fH * fW, 2)
    h = jnp.maximum(
        jnp.dot(norm_xy, w1, precision=jax.lax.Precision.HIGHEST) + b1, 0.0)
    pos_feats = jnp.dot(h, w2, precision=jax.lax.Precision.HIGHEST) + b2  # [HW, C]
    return in_feat_map + pos_feats.T.reshape(1, C, fH, fW)


if __name__ == "__main__":
    # Small shapes consistent with the module: batch=2, feat_size=4, fH=fW=16.
    N, C, fH, fW = 2, 4, 16, 16
    hidden = 32

    key = jax.random.PRNGKey(0)
    k_x, k_w1, k_b1, k_w2, k_b2 = jax.random.split(key, 5)

    in_feat_map = jax.random.normal(k_x, (N, C, fH, fW), dtype=jnp.float32)

    # Deterministic position-encoder MLP params: Linear(2,H) -> ReLU -> Linear(H,C).
    w1 = jax.random.normal(k_w1, (2, hidden), dtype=jnp.float32) * 0.5
    b1 = jax.random.normal(k_b1, (1, hidden), dtype=jnp.float32) * 0.1
    w2 = jax.random.normal(k_w2, (hidden, C), dtype=jnp.float32) * 0.5
    b2 = jax.random.normal(k_b2, (1, C), dtype=jnp.float32) * 0.1

    ref = _reference(in_feat_map, w1, b1, w2, b2)

    out = pos_map_fusion(in_feat_map, w1, b1, w2, b2)
    out = jax.block_until_ready(out)

    assert out.shape == (N, C, fH, fW)
    assert jnp.allclose(out, ref, atol=1e-4, rtol=1e-4), "mismatch vs reference"

    print("KERNEL_OK")
</pallas_src>

<mosaic_0001>
module attributes {stable_mosaic.version = 11 : i64} {
  func.func @_pos_map_fusion_kernel(%arg0: i32, %arg1: i32, %arg2: memref<2x256xf32, #tpu.memory_space<vmem>>, %arg3: memref<32x2xf32, #tpu.memory_space<vmem>>, %arg4: memref<32x1xf32, #tpu.memory_space<vmem>>, %arg5: memref<8x32xf32, #tpu.memory_space<vmem>>, %arg6: memref<8x1xf32, #tpu.memory_space<vmem>>, %arg7: memref<8x256xf32, #tpu.memory_space<vmem>>, %arg8: memref<8x256xf32, #tpu.memory_space<vmem>>) attributes {dimension_semantics = [#tpu.dimension_semantics<parallel>, #tpu.dimension_semantics<parallel>], iteration_bounds = array<i64: 1, 1>, scalar_prefetch = 0 : i64, scratch_operands = 0 : i64, tpu.core_type = #tpu.core_type<tc>, window_params = [{transform_indices = @transform_0, window_bounds = array<i64: 2, 256>}, {pipeline_mode = #tpu.pipeline_mode<synchronous>, transform_indices = @transform_1, window_bounds = array<i64: 32, 2>}, {pipeline_mode = #tpu.pipeline_mode<synchronous>, transform_indices = @transform_2, window_bounds = array<i64: 32, 1>}, {pipeline_mode = #tpu.pipeline_mode<synchronous>, transform_indices = @transform_3, window_bounds = array<i64: 8, 32>}, {pipeline_mode = #tpu.pipeline_mode<synchronous>, transform_indices = @transform_4, window_bounds = array<i64: 8, 1>}, {transform_indices = @transform_5, window_bounds = array<i64: 8, 256>}, {transform_indices = @transform_6, window_bounds = array<i64: 8, 256>}]} {
    %c0 = arith.constant 0 : index
    %c0_0 = arith.constant 0 : index
    %0 = vector.load %arg2[%c0, %c0_0] : memref<2x256xf32, #tpu.memory_space<vmem>>, vector<1x256xf32>
    %c1 = arith.constant 1 : index
    %c0_1 = arith.constant 0 : index
    %1 = vector.load %arg2[%c1, %c0_1] : memref<2x256xf32, #tpu.memory_space<vmem>>, vector<1x256xf32>
    %c0_2 = arith.constant 0 : index
    %c0_3 = arith.constant 0 : index
    %2 = vector.load %arg3[%c0_2, %c0_3] : memref<32x2xf32, #tpu.memory_space<vmem>>, vector<32x1xf32>
    %3 = vector.broadcast %2 : vector<32x1xf32> to vector<32x256xf32>
    %4 = vector.broadcast %0 : vector<1x256xf32> to vector<32x256xf32>
    %5 = arith.mulf %3, %4 : vector<32x256xf32>
    %c0_4 = arith.constant 0 : index
    %c1_5 = arith.constant 1 : index
    %6 = vector.load %arg3[%c0_4, %c1_5] : memref<32x2xf32, #tpu.memory_space<vmem>>, vector<32x1xf32>
    %7 = vector.broadcast %6 : vector<32x1xf32> to vector<32x256xf32>
    %8 = vector.broadcast %1 : vector<1x256xf32> to vector<32x256xf32>
    %9 = arith.mulf %7, %8 : vector<32x256xf32>
    %10 = arith.addf %5, %9 : vector<32x256xf32>
    %c0_6 = arith.constant 0 : index
    %c0_7 = arith.constant 0 : index
    %11 = vector.load %arg4[%c0_6, %c0_7] : memref<32x1xf32, #tpu.memory_space<vmem>>, vector<32x1xf32>
    %12 = vector.broadcast %11 : vector<32x1xf32> to vector<32x256xf32>
    %13 = arith.addf %10, %12 : vector<32x256xf32>
    %cst = arith.constant 0.000000e+00 : f32
    %14 = vector.broadcast %cst : f32 to vector<32x256xf32>
    %15 = arith.maximumf %13, %14 : vector<32x256xf32>
    %c0_8 = arith.constant 0 : index
    %c0_9 = arith.constant 0 : index
    %16 = vector.load %arg5[%c0_8, %c0_9] : memref<8x32xf32, #tpu.memory_space<vmem>>, vector<8x32xf32>
    %cst_10 = arith.constant dense<0.000000e+00> : vector<8x256xf32>
    %17 = tpu.matmul %16, %15, %cst_10 {dimension_numbers = #tpu.dot_dimension_numbers<[1], [0], [0], [1], [0, 0, 1, 1], [], []>, precision = #tpu.contract_precision<fp32>} : vector<8x32xf32>, vector<32x256xf32>, vector<8x256xf32> -> vector<8x256xf32>
    %c0_11 = arith.constant 0 : index
    %c0_12 = arith.constant 0 : index
    %18 = vector.load %arg6[%c0_11, %c0_12] : memref<8x1xf32, #tpu.memory_space<vmem>>, vector<8x1xf32>
    %19 = vector.broadcast %18 : vector<8x1xf32> to vector<8x256xf32>
    %20 = arith.addf %17, %19 : vector<8x256xf32>
    %c0_13 = arith.constant 0 : index
    %c0_14 = arith.constant 0 : index
    %21 = vector.load %arg7[%c0_13, %c0_14] : memref<8x256xf32, #tpu.memory_space<vmem>>, vector<8x256xf32>
    %22 = arith.addf %21, %20 : vector<8x256xf32>
    %c0_15 = arith.constant 0 : index
    %c0_16 = arith.constant 0 : index
    %23 = vector.load %arg8[%c0_15, %c0_16] : memref<8x256xf32, #tpu.memory_space<vmem>>, vector<8x256xf32>
    tpu.vector_store %arg8[%c0_15, %c0_16], %22 {strides = array<i32>} : memref<8x256xf32, #tpu.memory_space<vmem>>, vector<8x256xf32>,
    return
  }
  func.func @transform_0(%arg0: i32, %arg1: i32) -> (i32, i32) {
    %c0_i32 = arith.constant 0 : i32
    %c0_i32_0 = arith.constant 0 : i32
    return %c0_i32, %arg0 : i32, i32
  }
  func.func @transform_1(%arg0: i32, %arg1: i32) -> (i32, i32) {
    %c0_i32 = arith.constant 0 : i32
    %c0_i32_0 = arith.constant 0 : i32
    %c0_i32_1 = arith.constant 0 : i32
    return %c0_i32, %c0_i32_0 : i32, i32
  }
  func.func @transform_2(%arg0: i32, %arg1: i32) -> (i32, i32) {
    %c0_i32 = arith.constant 0 : i32
    %c0_i32_0 = arith.constant 0 : i32
    %c0_i32_1 = arith.constant 0 : i32
    return %c0_i32, %c0_i32_0 : i32, i32
  }
  func.func @transform_3(%arg0: i32, %arg1: i32) -> (i32, i32) {
    %c0_i32 = arith.constant 0 : i32
    %c0_i32_0 = arith.constant 0 : i32
    %c0_i32_1 = arith.constant 0 : i32
    return %c0_i32, %c0_i32_0 : i32, i32
  }
  func.func @transform_4(%arg0: i32, %arg1: i32) -> (i32, i32) {
    %c0_i32 = arith.constant 0 : i32
    %c0_i32_0 = arith.constant 0 : i32
    %c0_i32_1 = arith.constant 0 : i32
    return %c0_i32, %c0_i32_0 : i32, i32
  }
  func.func @transform_5(%arg0: i32, %arg1: i32) -> (i32, i32) {
    %c0_i32 = arith.constant 0 : i32
    return %arg1, %arg0 : i32, i32
  }
  func.func @transform_6(%arg0: i32, %arg1: i32) -> (i32, i32) {
    %c0_i32 = arith.constant 0 : i32
    return %arg1, %arg0 : i32, i32
  }
}

</mosaic_0001>

<bundles_post_ra>
// kernel: tpu_custom_call.1
= control target key start
LH: loop header
LB: loop body
LE: loop exit
PB: predicated region body
PF: predicated region fallthrough
CT: control target
= control target key end

     0   :  { %11 = vsyncpa [#allocation3], 0  ;;  %s976_s0 = inlined_call_operand.vmem [shape: f32[2,256], index: 0, kind: input, shape index: {}]   ;;  %s977_s1 = inlined_call_operand.vmem [shape: f32[32,2], index: 1, kind: input, shape index: {}]   ;;  %s978_s2 = inlined_call_operand.vmem [shape: f32[32,1], index: 2, kind: input, shape index: {}]   ;;  %s979_s3 = inlined_call_operand.vmem [shape: f32[8,32], index: 3, kind: input, shape index: {}]   ;;  %s980_s4 = inlined_call_operand.vmem [shape: f32[8,1], index: 4, kind: input, shape index: {}]   ;;  %s981_s5 = inlined_call_operand.hbm [shape: f32[8,256], index: 5, kind: input, shape index: {}, may-alias: {5,6}]   ;;  %s982_s6 = inlined_call_operand.hbm [shape: f32[8,256], index: 6, kind: output, shape index: {}, may-alias: {5,6}]  }
   0x1   :  { %12 = vsyncpa [#allocation4], 0  ;;  %s797_s21 = smov [#allocation2]  }
   0x2   :  { %s29_s22 = sshll.u32 %s797_s21, 4  ;;  %s30_s22 = int_to_ptr.vmem [resolvable:$true] %s29_s22 }
   0x3   :  { %s761_s23 = scalar_lea.vmem %s30_s22, 256  ;;  %p766_p1 = scmp.lt.s32.totalorder %s30_s22, %s30_s22 }
   0x4   :  { %p762_p0 = scmp.ne.s32.totalorder %s30_s22, %s761_s23  ;;  %p767_p2 = scmp.lt.s32.totalorder %s761_s23, %s761_s23 }
   0x6   :  { %p768_p3 = por %p767_p2, %p766_p1 }
   0x8   :  { %p769_p4 = pnand %p768_p3, %p762_p0 }
   0xa   :  { %772 = shalt.err (!%p769_p4)
}
   0xb   :  { %32 = dma.hbm_to_vmem [thread:$0]  %s981_s5, 256, %s30_s22, [#allocation3]  }
   0xc   :  { %793 = dma.done.wait [#allocation3], 256  }
   0xd   :  { %794 = vsyncadd [#allocation3], 4294967040  ;;  %v798_v0 = vmov 1   ;;  %v799_v1 = vmov 0   ;;  %v42_v2 = vld [vmem:[%s977_s1 + $0x18] sm:$0xff]  ;;  %v41_v3 = vld [vmem:[%s977_s1 + $0x10] sm:$0xff]  ;;  %v64_v12 = vlaneseq }
   0xe   :  { %746 = vset.pattern.permute.xlu0 %v798_v0  ;;  %747 = vset.pattern.permute.xlu1 %v799_v1  ;;  %v40_v4 = vld [vmem:[%s977_s1 + $0x8] sm:$0xff]  ;;  %v39_v5 = vld [vmem:[%s977_s1] sm:$0xff]  ;;  %v128_v6 = vld [vmem:[%s978_s2 + $0x18] sm:$0xff]  ;;  %v800_v11 = vmov 0.0   ;;  %vm172_vm0 = vcmask 261120  }
   0xf   :  { %95 = vperm.xlu0 %746, %v42_v2   ;;  %55 = vperm.xlu1 %747, %v41_v3   ;;  %v126_v7 = vld [vmem:[%s978_s2 + $0x8] sm:$0xff]  ;;  %v166_v8 = vld [vmem:[%s980_s4] sm:$0xff]  ;;  %v127_v9 = vld [vmem:[%s978_s2 + $0x10] sm:$0xff]  ;;  %v65_v13 = vshrl.u32 %v64_v12, 7 }
  0x10   :  { %v125_v10 = vld [vmem:[%s978_s2] sm:$0xff]  ;;  %248 = vmatprep.mubr.f32.mxu0 %v800_v11  ;;  %364 = vmatprep.mubr.f32.mxu1 %v800_v11 }
  0x11   :  { %v740_v16 = vld [vmem:[%s976_s0 + $0x1] ss:$2 sm:$0x3]  ;;  %v66_v17 = vsub.s32 0, %v65_v13  ;;  %v70_v18 = vsub.s32 1, %v65_v13 }
  0x12   :  { %v36_v20 = vld [vmem:[%s976_s0] ss:$2 sm:$0x3]  ;;  %s801_s0 = smov [#allocation5]  }
  0x13   :  { %748 = vset.pattern.permute.xlu1 %v798_v0  ;;  %87 = vperm.xlu0 %746, %v40_v4   ;;  %v102_v22 = vrot.slane %v740_v16, %v66_v17  ;;  %v106_v23 = vrot.slane %v740_v16, %v70_v18  ;;  %v67_v24 = vrot.slane %v36_v20, %v66_v17  ;;  %v165_v32 = vld [vmem:[%s979_s3] sm:$0xff]  ;;  %s731_s3 = sshll.u32 %s801_s0, 4  ;;  %s732_s3 = int_to_ptr.vmem [resolvable:$true] %s731_s3 }
  0x14   :  { %91 = vperm.xlu1 %748, %v41_v3   ;;  %v71_v25 = vrot.slane %v36_v20, %v70_v18  ;;  %v174_v40 = vsel %vm172_vm0, %v165_v32, 0  ;;  %s773_s22 = scalar_lea.vmem %s732_s3, 256  ;;  %p778_p6 = scmp.lt.s32.totalorder %s732_s3, %s732_s3 }
  0x15   :  { %v878_v46 = vand.u32 4294901760, %v174_v40  ;;  %p774_p5 = scmp.ne.s32.totalorder %s732_s3, %s773_s22  ;;  %p779_p7 = scmp.lt.s32.totalorder %s773_s22, %s773_s22 }
  0x17   :  { %750 = vset.pattern.permute.xlu0 %v799_v1  ;;  %v885_v60 = vsub.f32 %v174_v40, %v878_v46  ;;  %p780_p8 = por %p779_p7, %p778_p6 }
  0x18   :  { %749 = vset.pattern.permute.xlu1 %v799_v1  ;;  %60 = vperm.xlu0 %750, %v42_v2  }
  0x19   :  { %50 = vperm.xlu1 %749, %v40_v4   ;;  %v251_v12 = vand.u32 4294901760, %v885_v60  ;;  %p781_p9 = pnand %p780_p8, %p774_p5 }
  0x1c   :  { %45 = vperm.xlu0 %750, %v39_v5  }
  0x1d   :  { %146 = vperm.xlu1 %749, %v128_v6  }
  0x20   :  { %136 = vperm.xlu0 %750, %v126_v7  }
  0x21   :  { %751 = vset.pattern.permute.xlu1 %v798_v0 }
  0x22   :  { %83 = vperm.xlu1 %751, %v39_v5  }
  0x24   :  { %169 = vperm.xlu0 %750, %v166_v8  }
  0x26   :  { %752 = vset.pattern.permute.xlu1 %v799_v1 }
  0x27   :  { %141 = vperm.xlu1 %752, %v127_v9  }
  0x2b   :  { %131 = vperm.xlu1 %752, %v125_v10  }
  0x8a   :  { %v56_v14 = vpop.permute.xlu1 %55  ;;  %v96_v15 = vpop.permute.xlu0 %95 }
  0x8b   :  { %v115_v26 = vmul.f32 %v102_v22, %v96_v15  ;;  %v116_v27 = vmul.f32 %v106_v23, %v96_v15  ;;  %v78_v57 = vmul.f32 %v67_v24, %v56_v14  ;;  %v79_v61 = vmul.f32 %v71_v25, %v56_v14 }
  0x8e   :  { %v88_v19 = vpop.permute.xlu0 %87 }
  0x8f   :  { %v92_v21 = vpop.permute.xlu1 %91  ;;  %v111_v33 = vmul.f32 %v102_v22, %v88_v19  ;;  %v112_v34 = vmul.f32 %v106_v23, %v88_v19 }
  0x90   :  { %v113_v52 = vmul.f32 %v102_v22, %v92_v21  ;;  %v114_v53 = vmul.f32 %v106_v23, %v92_v21 }
  0x92   :  { %v121_v5 = vadd.f32 %v113_v52, %v78_v57  ;;  %v122_v6 = vadd.f32 %v114_v53, %v79_v61 }
  0x93   :  { %v61_v28 = vpop.permute.xlu0 %60 }
  0x94   :  { %v80_v29 = vmul.f32 %v67_v24, %v61_v28  ;;  %v81_v30 = vmul.f32 %v71_v25, %v61_v28  ;;  %v51_v31 = vpop.permute.xlu1 %50 }
  0x95   :  { %v76_v35 = vmul.f32 %v67_v24, %v51_v31  ;;  %v77_v36 = vmul.f32 %v71_v25, %v51_v31 }
  0x96   :  { %v123_v37 = vadd.f32 %v115_v26, %v80_v29  ;;  %v124_v38 = vadd.f32 %v116_v27, %v81_v30  ;;  %v252_v26 = vsub.f32 %v885_v60, %v251_v12 }
  0x97   :  { %v46_v39 = vpop.permute.xlu0 %45  ;;  %v119_v44 = vadd.f32 %v111_v33, %v76_v35  ;;  %v120_v45 = vadd.f32 %v112_v34, %v77_v36 }
  0x98   :  { %v147_v41 = vpop.permute.xlu1 %146  ;;  %v74_v62 = vmul.f32 %v67_v24, %v46_v39  ;;  %v75_v1 = vmul.f32 %v71_v25, %v46_v39  ;;  %v253_v36 = vand.u32 4294901760, %v252_v26 }
  0x99   :  { %v155_v42 = vadd.f32 %v147_v41, %v123_v37  ;;  %v156_v43 = vadd.f32 %v147_v41, %v124_v38 }
  0x9b   :  { %v163_v47 = vmax.f32 %v155_v42, 0.0  ;;  %v164_v48 = vmax.f32 %v156_v43, 0.0  ;;  %v137_v49 = vpop.permute.xlu0 %136 }
  0x9c   :  { %v151_v50 = vadd.f32 %v137_v49, %v119_v44  ;;  %v152_v51 = vadd.f32 %v137_v49, %v120_v45 }
  0x9d   :  { %v880_v54 = vand.u32 4294901760, %v164_v48  ;;  %v882_v55 = vand.u32 4294901760, %v163_v47  ;;  %v84_v56 = vpop.permute.xlu1 %83 }
  0x9e   :  { %v159_v58 = vmax.f32 %v151_v50, 0.0  ;;  %v160_v59 = vmax.f32 %v152_v51, 0.0  ;;  %v109_v3 = vmul.f32 %v102_v22, %v84_v56  ;;  %v110_v4 = vmul.f32 %v106_v23, %v84_v56 }
  0x9f   :  { %v888_v63 = vsub.f32 %v164_v48, %v880_v54  ;;  %v891_v0 = vsub.f32 %v163_v47, %v882_v55  ;;  %201 = vmatprep.subr.mxu0 %v880_v54 }
  0xa0   :  { %v894_v2 = vand.u32 4294901760, %v160_v59  ;;  %203 = vmatpush1.msra.mxu0 %v882_v55  ;;  %v899_v9 = vand.u32 4294901760, %v159_v58  ;;  %v117_v18 = vadd.f32 %v109_v3, %v74_v62  ;;  %v118_v19 = vadd.f32 %v110_v4, %v75_v1 }
  0xa1   :  { %v286_v7 = vand.u32 4294901760, %v888_v63  ;;  %v292_v8 = vand.u32 4294901760, %v891_v0 }
  0xa2   :  { %v142_v10 = vpop.permute.xlu1 %141  ;;  %v909_v17 = vsub.f32 %v160_v59, %v894_v2  ;;  %v912_v24 = vsub.f32 %v159_v58, %v899_v9 }
  0xa3   :  { %v153_v13 = vadd.f32 %v142_v10, %v121_v5  ;;  %v154_v14 = vadd.f32 %v142_v10, %v122_v6  ;;  %v287_v15 = vsub.f32 %v888_v63, %v286_v7  ;;  %v293_v16 = vsub.f32 %v891_v0, %v292_v8 }
  0xa4   :  { %v310_v31 = vand.u32 4294901760, %v909_v17  ;;  %v316_v37 = vand.u32 4294901760, %v912_v24 }
  0xa5   :  { %v161_v20 = vmax.f32 %v153_v13, 0.0  ;;  %v162_v21 = vmax.f32 %v154_v14, 0.0  ;;  %v288_v22 = vand.u32 4294901760, %v287_v15  ;;  %v294_v23 = vand.u32 4294901760, %v293_v16  ;;  %v719_v15 = vld [vmem:[#allocation2] sm:$0xff] }
  0xa6   :  { %v132_v25 = vpop.permute.xlu1 %131  ;;  %v311_v42 = vsub.f32 %v909_v17, %v310_v31  ;;  %v317_v48 = vsub.f32 %v912_v24, %v316_v37 }
  0xa7   :  { %v917_v27 = vand.u32 4294901760, %v162_v21  ;;  %v919_v28 = vand.u32 4294901760, %v161_v20  ;;  %v149_v29 = vadd.f32 %v132_v25, %v117_v18  ;;  %v150_v30 = vadd.f32 %v132_v25, %v118_v19  ;;  %289 = vmatprep.subr.mxu1 %v288_v22  ;;  %v720_v19 = vld [vmem:[#allocation2 + $0x8] sm:$0xff] }
  0xa8   :  { %295 = vmatpush1.msra.mxu1 %v294_v23  ;;  %v312_v53 = vand.u32 4294901760, %v311_v42  ;;  %v318_v58 = vand.u32 4294901760, %v317_v48 }
  0xa9   :  { %v297_v32 = vsub.f32 %v162_v21, %v917_v27  ;;  %v303_v33 = vsub.f32 %v161_v20, %v919_v28  ;;  %v157_v34 = vmax.f32 %v149_v29, 0.0  ;;  %v158_v35 = vmax.f32 %v150_v30, 0.0  ;;  %205 = vmatprep.subr.mxu0 %v917_v27 }
  0xaa   :  { %207 = vmatpush1.msra.mxu0 %v919_v28 }
  0xab   :  { %v927_v38 = vand.u32 4294901760, %v158_v35  ;;  %v929_v39 = vand.u32 4294901760, %v157_v34  ;;  %209 = vmatprep.subr.mxu0 %v894_v2  ;;  %v298_v40 = vand.u32 4294901760, %v297_v32  ;;  %v304_v41 = vand.u32 4294901760, %v303_v33 }
  0xac   :  { %211 = vmatpush1.msra.mxu0 %v899_v9 }
  0xad   :  { %v321_v43 = vsub.f32 %v158_v35, %v927_v38  ;;  %v327_v44 = vsub.f32 %v157_v34, %v929_v39  ;;  %213 = vmatprep.subr.mxu0 %v927_v38  ;;  %v299_v45 = vsub.f32 %v297_v32, %v298_v40  ;;  %v305_v47 = vsub.f32 %v303_v33, %v304_v41 }
  0xae   :  { %215 = vmatpush1.msra.mxu0 %v929_v39 }
  0xaf   :  { %254 = vmatmul.mubr.f32.vlgmr.msra.gmra.mxu0 %v253_v36  ;;  %398 = vmatprep.subr.mxu0 %v888_v63  ;;  %v300_v49 = vand.u32 4294901760, %v299_v45  ;;  %v306_v50 = vand.u32 4294901760, %v305_v47  ;;  %v322_v51 = vand.u32 4294901760, %v321_v43  ;;  %v328_v52 = vand.u32 4294901760, %v327_v44 }
  0xb0   :  { %401 = vmatpush1.msra.mxu0 %v891_v0  ;;  %452 = vmatprep.mubr.f32.mxu0 %v800_v11 }
  0xb1   :  { %301 = vmatprep.subr.mxu1 %v300_v49  ;;  %404 = vmatprep.subr.mxu0 %v297_v32  ;;  %v323_v56 = vsub.f32 %v321_v43, %v322_v51  ;;  %v329_v57 = vsub.f32 %v327_v44, %v328_v52 }
  0xb2   :  { %307 = vmatpush1.msra.mxu1 %v306_v50  ;;  %407 = vmatpush1.msra.mxu0 %v303_v33 }
  0xb3   :  { %313 = vmatprep.subr.mxu1 %v312_v53  ;;  %410 = vmatprep.subr.mxu0 %v909_v17  ;;  %v324_v59 = vand.u32 4294901760, %v323_v56  ;;  %v330_v61 = vand.u32 4294901760, %v329_v57 }
  0xb4   :  { %319 = vmatpush1.msra.mxu1 %v318_v58  ;;  %413 = vmatpush1.msra.mxu0 %v912_v24 }
  0xb5   :  { %325 = vmatprep.subr.mxu1 %v324_v59  ;;  %416 = vmatprep.subr.mxu0 %v321_v43 }
  0xb6   :  { %331 = vmatpush1.msra.mxu1 %v330_v61  ;;  %419 = vmatpush1.msra.mxu0 %v327_v44 }
  0xb7   :  { %366 = vmatmul.mubr.f32.vlgmr.msra.gmra.mxu1 %v878_v46  ;;  %486 = vmatprep.subr.mxu1 %v880_v54 }
  0xb8   :  { %570 = vmatprep.subr.mxu0 %v286_v7  ;;  %455 = vmatmul.mubr.f32.vlgmr.msra.gmra.mxu0 %v885_v60  ;;  %v170_v60 = vpop.permute.xlu0 %169 }
  0xb9   :  { %488 = vmatpush1.msra.mxu1 %v882_v55  ;;  %574 = vmatpush1.msra.mxu0 %v292_v8 }
  0xba   :  { %490 = vmatprep.subr.mxu1 %v917_v27  ;;  %578 = vmatprep.subr.mxu0 %v298_v40 }
  0xbb   :  { %492 = vmatpush1.msra.mxu1 %v919_v28  ;;  %582 = vmatpush1.msra.mxu0 %v304_v41 }
  0xbc   :  { %494 = vmatprep.subr.mxu1 %v894_v2  ;;  %586 = vmatprep.subr.mxu0 %v310_v31 }
  0xbd   :  { %496 = vmatpush1.msra.mxu1 %v899_v9  ;;  %590 = vmatpush1.msra.mxu0 %v316_v37 }
  0xbe   :  { %498 = vmatprep.subr.mxu1 %v927_v38  ;;  %594 = vmatprep.subr.mxu0 %v322_v51 }
  0xbf   :  { %500 = vmatpush1.msra.mxu1 %v929_v39  ;;  %533 = vmatprep.mubr.f32.mxu1 %v800_v11 }
  0xc0   :  { %598 = vmatpush1.msra.mxu0 %v328_v52  ;;  %537 = vmatmul.mubr.f32.vlgmr.msra.gmra.mxu1 %v251_v12 }
  0xc1   :  { %664 = vmatprep.subr.mxu1 %v880_v54  ;;  %631 = vmatprep.mubr.f32.mxu0 %v800_v11 }
  0xc2   :  { %666 = vmatpush1.msra.mxu1 %v882_v55  ;;  %633 = vmatmul.mubr.f32.vlgmr.msra.gmra.mxu0 %v878_v46 }
  0xc3   :  { %668 = vmatprep.subr.mxu1 %v917_v27  ;;  %711 = vmatprep.mubr.f32.mxu1 %v800_v11 }
  0xc4   :  { %670 = vmatpush1.msra.mxu1 %v919_v28 }
  0xc5   :  { %672 = vmatprep.subr.mxu1 %v894_v2 }
  0xc6   :  { %674 = vmatpush1.msra.mxu1 %v899_v9 }
  0xc7   :  { %676 = vmatprep.subr.mxu1 %v927_v38 }
  0xc8   :  { %678 = vmatpush1.msra.mxu1 %v929_v39 }
  0xc9   :  { %713 = vmatmul.mubr.f32.vlgmr.msra.gmra.mxu1 %v878_v46 }
 0x16f   :  { %v255_v54 = vpop.f32.mrf.mxu0 }
 0x170   :  { %v256_v63 = vadd.f32 %v255_v54, %v170_v60 }
 0x171   :  { %v257_v62 = vpop.f32.mrf.mxu0 }
 0x172   :  { %v258_v11 = vadd.f32 %v257_v62, %v170_v60 }
 0x177   :  { %v367_v55 = vpop.f32.mrf.mxu1 }
 0x178   :  { %v456_v1 = vpop.f32.mrf.mxu0  ;;  %v368_v3 = vadd.f32 %v367_v55, %v256_v63 }
 0x179   :  { %v369_v0 = vpop.f32.mrf.mxu1 }
 0x17a   :  { %v370_v4 = vadd.f32 %v369_v0, %v258_v11  ;;  %v458_v2 = vpop.f32.mrf.mxu0  ;;  %v457_v6 = vadd.f32 %v456_v1, %v368_v3 }
 0x17c   :  { %v459_v9 = vadd.f32 %v458_v2, %v370_v4 }
 0x180   :  { %v538_v5 = vpop.f32.mrf.mxu1 }
 0x181   :  { %v539_v10 = vadd.f32 %v538_v5, %v457_v6 }
 0x182   :  { %v540_v7 = vpop.f32.mrf.mxu1  ;;  %v634_v8 = vpop.f32.mrf.mxu0 }
 0x183   :  { %v541_v12 = vadd.f32 %v540_v7, %v459_v9  ;;  %v635_v46 = vadd.f32 %v634_v8, %v539_v10 }
 0x184   :  { %v636_v13 = vpop.f32.mrf.mxu0 }
 0x185   :  { %v637_v16 = vadd.f32 %v636_v13, %v541_v12 }
 0x189   :  { %v714_v14 = vpop.f32.mrf.mxu1 }
 0x18a   :  { %v715_v17 = vadd.f32 %v714_v14, %v635_v46 }
 0x18b   :  { %v716_v18 = vpop.f32.mrf.mxu1 }
 0x18c   :  { %v721_v20 = vadd.f32 %v719_v15, %v715_v17  ;;  %v717_v21 = vadd.f32 %v716_v18, %v637_v16 }
 0x18e   :  { %723 = vst [vmem:[#allocation5] sm:$0xff] %v721_v20  ;;  %v722_v22 = vadd.f32 %v720_v19, %v717_v21 }
 0x190   :  { %724 = vst [vmem:[#allocation5 + $0x8] sm:$0xff] %v722_v22 }
 0x191   :  { %784 = shalt.err (!%p781_p9)
}
 0x192   :  { %734 = dma.vmem_to_hbm [thread:$0]  %s732_s3, 256, %s982_s6, [#allocation4]  }
 0x193   :  { %795 = dma.done.wait [#allocation4], 256  }
 0x194   :  { %796 = vsyncadd [#allocation4], 4294967040 }
 0x195   :  { %738 = vsyncpa [#allocation3], 1 }
 0x196   :  { %739 = vsyncpa [#allocation4], 1 }

</bundles_post_ra>
